<compile_context>
chip_gen: v5e
topology: v5e:2x2
jax: 0.10.0
libtpu: 0.0.40
codegen_flags: <defaults>
</compile_context>

<pallas_src>
import jax
import jax.numpy as jnp
from jax.experimental import pallas as pl
from jax.experimental.pallas import tpu as pltpu


def _sigmoid(z):
    # Numerically stable logistic: exp runs on the EUP, never overflows.
    ez = jnp.exp(-jnp.abs(z))
    pos = 1.0 / (1.0 + ez)
    return jnp.where(z >= 0, pos, 1.0 - pos)


# ----------------------------------------------------------------------------
# Fused Pallas kernel: TB batch elements per grid step.
# ----------------------------------------------------------------------------
def _cs_block_kernel(x_ref, w1t_ref, w2t_ref, wc_ref, out_ref):
    f32 = jnp.float32
    x = x_ref[...].astype(f32)                        # (TB, C, HW)
    tb, c, hw = x.shape

    # ---------------- channel attention --------------------------------------
    # Global avg / max pool over the spatial (lane) axis.
    s_avg = jnp.sum(x, axis=2) * (1.0 / hw)           # (TB, C)
    s_max = jnp.max(x, axis=2)                        # (TB, C)
    s_both = jnp.concatenate([s_avg, s_max], axis=0)  # (2*TB, C)

    # Shared MLP: one matmul for both branches, then exploit linearity of the
    # second FC: W2 @ h_avg + W2 @ h_max == W2 @ (h_avg + h_max).
    h = jnp.maximum(
        jnp.dot(s_both, w1t_ref[...], preferred_element_type=f32), 0.0)  # (2*TB, C_red)
    h_sum = h[:tb] + h[tb:]                                              # (TB, C_red)
    gate = _sigmoid(
        jnp.dot(h_sum, w2t_ref[...], preferred_element_type=f32))        # (TB, C)

    out1 = gate[:, :, None] * x                       # (TB, C, HW) channel-weighted

    # ---------------- spatial attention --------------------------------------
    m_avg = jnp.sum(out1, axis=1, keepdims=True) * (1.0 / c)   # (TB, 1, HW)
    m_max = jnp.max(out1, axis=1, keepdims=True)               # (TB, 1, HW)
    w_avg = wc_ref[0]                                 # SMEM scalar (conv weight, avg ch)
    w_max = wc_ref[1]                                 # SMEM scalar (conv weight, max ch)
    sa = _sigmoid(w_avg * m_avg + w_max * m_max)                # (TB, 1, HW)

    out_ref[...] = (sa * out1).astype(out_ref.dtype)


# ----------------------------------------------------------------------------
# Batch-block selection: biggest divisor of B under the VMEM target that still
# leaves >= 2 grid steps (keeps both v7x TensorCores fed).
# ----------------------------------------------------------------------------
def _choose_tb(b, per_image_bytes, target_bytes):
    best = 1
    for tb in range(1, b + 1):
        if b % tb != 0:
            continue
        if tb * per_image_bytes > target_bytes:
            break
        if b // tb < min(2, b):
            continue
        best = tb
    return best


# ----------------------------------------------------------------------------
# Wrapper: reshape NCHW <-> (B, C, H*W) and invoke pallas_call.
# ----------------------------------------------------------------------------
def cs_block_forward(x, params, *, target_block_bytes=4 << 20):
    """x: (B, C, H, W), any float dtype (dtype preserved through HBM).
    params: w_fc1 (C_red, C), w_fc2 (C, C_red), w_conv (1, 2, 1, 1).
    Returns (B, C, H, W) in x.dtype (PyTorch forward semantics)."""
    b, c, h, w = x.shape
    hw = h * w
    c_red = params["w_fc1"].shape[0]

    x_flat = x.reshape(b, c, hw)                       # keep input dtype (bf16 ok)
    w1_t = params["w_fc1"].astype(jnp.float32).T       # (C, C_red)
    w2_t = params["w_fc2"].astype(jnp.float32).T       # (C_red, C)
    w_conv = params["w_conv"].reshape(2).astype(jnp.float32)  # [w_avg, w_max]

    per_image_bytes = c * hw * x_flat.dtype.itemsize
    tb = _choose_tb(b, per_image_bytes, target_block_bytes)
    block_bytes = tb * per_image_bytes

    # Double-buffered input + output blocks + resident weights + slack.
    weight_bytes = (w1_t.size + w2_t.size) * 4
    vmem_limit = int(max(4 * block_bytes + 4 * weight_bytes + (4 << 20), 16 << 20))
    vmem_limit = min(vmem_limit, 100 << 20)

    out_flat = pl.pallas_call(
        _cs_block_kernel,
        out_shape=jax.ShapeDtypeStruct((b, c, hw), x_flat.dtype),
        grid_spec=pltpu.PrefetchScalarGridSpec(
            num_scalar_prefetch=0,
            grid=(b // tb,),
            in_specs=[
                # TB whole (C, HW) images per grid step.
                pl.BlockSpec((tb, c, hw), lambda i: (i, 0, 0)),
                # Tiny MLP weights (pre-transposed): constant index map, resident.
                pl.BlockSpec((c, c_red), lambda i: (0, 0)),
                pl.BlockSpec((c_red, c), lambda i: (0, 0)),
                # 1x1-conv weights as SMEM scalars.
                pl.BlockSpec(memory_space=pltpu.MemorySpace.SMEM),
            ],
            out_specs=pl.BlockSpec((tb, c, hw), lambda i: (i, 0, 0)),
        ),
        compiler_params=pltpu.CompilerParams(
            dimension_semantics=("parallel",),
            vmem_limit_bytes=vmem_limit),
    )(x_flat, w1_t, w2_t, w_conv)

    return out_flat.reshape(b, c, h, w)


# ----------------------------------------------------------------------------
# Pure-JAX reference (mirrors the PyTorch forward) for a correctness check.
# ----------------------------------------------------------------------------
def cs_block_reference(x, params):
    xf = x.astype(jnp.float32)
    s_avg = jnp.mean(xf, axis=(2, 3))                      # (B, C)
    s_max = jnp.max(xf, axis=(2, 3))                       # (B, C)

    def fc(s):
        h1 = jnp.maximum(s @ params["w_fc1"].T, 0.0)       # (B, C_red)
        return h1 @ params["w_fc2"].T                      # (B, C)

    gate = jax.nn.sigmoid(fc(s_avg) + fc(s_max))           # (B, C)
    out1 = gate[:, :, None, None] * xf                     # channel attention

    m_avg = jnp.mean(out1, axis=1, keepdims=True)          # (B, 1, H, W)
    m_max = jnp.max(out1, axis=1, keepdims=True)           # (B, 1, H, W)
    wc = params["w_conv"].reshape(2)
    sa = jax.nn.sigmoid(wc[0] * m_avg + wc[1] * m_max)     # spatial attention
    return (sa * out1).astype(x.dtype)


def init_params(key, in_channel, reduction):
    c_red = in_channel // reduction
    k1, k2, k3 = jax.random.split(key, 3)
    s = 0.2
    return {
        "w_fc1": jax.random.normal(k1, (c_red, in_channel), jnp.float32) * s,
        "w_fc2": jax.random.normal(k2, (in_channel, c_red), jnp.float32) * s,
        "w_conv": jax.random.normal(k3, (1, 2, 1, 1), jnp.float32) * s,
    }


if __name__ == "__main__":
    key = jax.random.PRNGKey(0)
    b, c, h, w = 2, 32, 16, 16       # in_channel=32, reduction=16 -> hidden=2
    reduction = 16

    kx, kp = jax.random.split(key)
    x = jax.random.normal(kx, (b, c, h, w), jnp.float32)
    params = init_params(kp, c, reduction)

    out = jax.block_until_ready(cs_block_forward(x, params))
    ref = jax.block_until_ready(cs_block_reference(x, params))

    assert out.shape == (b, c, h, w), out.shape
    assert jnp.allclose(out, ref, rtol=1e-4, atol=1e-4), float(
        jnp.max(jnp.abs(out - ref)))

    print("KERNEL_OK")
</pallas_src>

<mosaic_0001>
module attributes {stable_mosaic.version = 11 : i64} {
  func.func @_cs_block_kernel(%arg0: i32, %arg1: memref<1x32x256xf32, #tpu.memory_space<vmem>>, %arg2: memref<32x2xf32, #tpu.memory_space<vmem>>, %arg3: memref<2x32xf32, #tpu.memory_space<vmem>>, %arg4: memref<2xf32, #tpu.memory_space<smem>>, %arg5: memref<1x32x256xf32, #tpu.memory_space<vmem>>) attributes {dimension_semantics = [#tpu.dimension_semantics<parallel>], iteration_bounds = array<i64: 2>, scalar_prefetch = 0 : i64, scratch_operands = 0 : i64, tpu.core_type = #tpu.core_type<tc>, window_params = [{transform_indices = @transform_0, window_bounds = array<i64: 1, 32, 256>}, {pipeline_mode = #tpu.pipeline_mode<synchronous>, transform_indices = @transform_1, window_bounds = array<i64: 32, 2>}, {pipeline_mode = #tpu.pipeline_mode<synchronous>, transform_indices = @transform_2, window_bounds = array<i64: 2, 32>}, {transform_indices = @transform_3, window_bounds = array<i64: 2>}, {transform_indices = @transform_4, window_bounds = array<i64: 1, 32, 256>}]} {
    %c0 = arith.constant 0 : index
    %c0_0 = arith.constant 0 : index
    %c0_1 = arith.constant 0 : index
    %0 = vector.load %arg1[%c0, %c0_0, %c0_1] : memref<1x32x256xf32, #tpu.memory_space<vmem>>, vector<1x32x256xf32>
    %cst = arith.constant dense<0.000000e+00> : vector<1x32xf32>
    %1 = vector.multi_reduction <add>, %0, %cst [2] : vector<1x32x256xf32> to vector<1x32xf32>
    %cst_2 = arith.constant 3.906250e-03 : f32
    %2 = vector.broadcast %cst_2 : f32 to vector<1x32xf32>
    %3 = arith.mulf %1, %2 : vector<1x32xf32>
    %cst_3 = arith.constant dense<0xFF800000> : vector<1x32xf32>
    %4 = vector.multi_reduction <maximumf>, %0, %cst_3 [2] : vector<1x32x256xf32> to vector<1x32xf32>
    %5 = tpu.concatenate %3, %4 in 0 : vector<1x32xf32>, vector<1x32xf32> -> vector<2x32xf32>
    %c0_4 = arith.constant 0 : index
    %c0_5 = arith.constant 0 : index
    %6 = vector.load %arg2[%c0_4, %c0_5] : memref<32x2xf32, #tpu.memory_space<vmem>>, vector<32x2xf32>
    %cst_6 = arith.constant dense<0.000000e+00> : vector<2x2xf32>
    %7 = tpu.matmul %5, %6, %cst_6 {dimension_numbers = #tpu.dot_dimension_numbers<[1], [0], [0], [1], [0, 0, 1, 1], [], []>} : vector<2x32xf32>, vector<32x2xf32>, vector<2x2xf32> -> vector<2x2xf32>
    %cst_7 = arith.constant 0.000000e+00 : f32
    %8 = vector.broadcast %cst_7 : f32 to vector<2x2xf32>
    %9 = arith.maximumf %7, %8 : vector<2x2xf32>
    %10 = vector.extract_strided_slice %9 {offsets = [0, 0], sizes = [1, 2], strides = [1, 1]} : vector<2x2xf32> to vector<1x2xf32>
    %11 = vector.extract_strided_slice %9 {offsets = [1, 0], sizes = [1, 2], strides = [1, 1]} : vector<2x2xf32> to vector<1x2xf32>
    %12 = arith.addf %10, %11 : vector<1x2xf32>
    %c0_8 = arith.constant 0 : index
    %c0_9 = arith.constant 0 : index
    %13 = vector.load %arg3[%c0_8, %c0_9] : memref<2x32xf32, #tpu.memory_space<vmem>>, vector<2x32xf32>
    %cst_10 = arith.constant dense<0.000000e+00> : vector<1x32xf32>
    %14 = tpu.matmul %12, %13, %cst_10 {dimension_numbers = #tpu.dot_dimension_numbers<[1], [0], [0], [1], [0, 0, 1, 1], [], []>} : vector<1x2xf32>, vector<2x32xf32>, vector<1x32xf32> -> vector<1x32xf32>
    %15 = math.absf %14 : vector<1x32xf32>
    %cst_11 = arith.constant 0.000000e+00 : f32
    %16 = vector.broadcast %cst_11 : f32 to vector<1x32xf32>
    %17 = arith.subf %16, %15 : vector<1x32xf32>
    %18 = math.exp %17 : vector<1x32xf32>
    %cst_12 = arith.constant 1.000000e+00 : f32
    %19 = vector.broadcast %cst_12 : f32 to vector<1x32xf32>
    %20 = arith.addf %19, %18 : vector<1x32xf32>
    %cst_13 = arith.constant 1.000000e+00 : f32
    %21 = vector.broadcast %cst_13 : f32 to vector<1x32xf32>
    %22 = arith.divf %21, %20 : vector<1x32xf32>
    %cst_14 = arith.constant 0.000000e+00 : f32
    %23 = vector.broadcast %cst_14 : f32 to vector<1x32xf32>
    %24 = arith.cmpf oge, %14, %23 : vector<1x32xf32>
    %cst_15 = arith.constant 1.000000e+00 : f32
    %25 = vector.broadcast %cst_15 : f32 to vector<1x32xf32>
    %26 = arith.subf %25, %22 : vector<1x32xf32>
    %27 = arith.select %24, %22, %26 : vector<1x32xi1>, vector<1x32xf32>
    %28 = vector.shape_cast %27 : vector<1x32xf32> to vector<1x32x1xf32>
    %29 = vector.broadcast %28 : vector<1x32x1xf32> to vector<1x32x256xf32>
    %30 = arith.mulf %29, %0 : vector<1x32x256xf32>
    %cst_16 = arith.constant dense<0.000000e+00> : vector<1x256xf32>
    %31 = vector.multi_reduction <add>, %30, %cst_16 [1] : vector<1x32x256xf32> to vector<1x256xf32>
    %32 = vector.shape_cast %31 : vector<1x256xf32> to vector<1x1x256xf32>
    %cst_17 = arith.constant 3.125000e-02 : f32
    %33 = vector.broadcast %cst_17 : f32 to vector<1x1x256xf32>
    %34 = arith.mulf %32, %33 : vector<1x1x256xf32>
    %cst_18 = arith.constant dense<0xFF800000> : vector<1x256xf32>
    %35 = vector.multi_reduction <maximumf>, %30, %cst_18 [1] : vector<1x32x256xf32> to vector<1x256xf32>
    %36 = vector.shape_cast %35 : vector<1x256xf32> to vector<1x1x256xf32>
    %c0_19 = arith.constant 0 : index
    %37 = memref.load %arg4[%c0_19] : memref<2xf32, #tpu.memory_space<smem>>
    %c1 = arith.constant 1 : index
    %38 = memref.load %arg4[%c1] : memref<2xf32, #tpu.memory_space<smem>>
    %39 = vector.broadcast %37 : f32 to vector<1x1x256xf32>
    %40 = arith.mulf %39, %34 : vector<1x1x256xf32>
    %41 = vector.broadcast %38 : f32 to vector<1x1x256xf32>
    %42 = arith.mulf %41, %36 : vector<1x1x256xf32>
    %43 = arith.addf %40, %42 : vector<1x1x256xf32>
    %44 = math.absf %43 : vector<1x1x256xf32>
    %cst_20 = arith.constant 0.000000e+00 : f32
    %45 = vector.broadcast %cst_20 : f32 to vector<1x1x256xf32>
    %46 = arith.subf %45, %44 : vector<1x1x256xf32>
    %47 = math.exp %46 : vector<1x1x256xf32>
    %cst_21 = arith.constant 1.000000e+00 : f32
    %48 = vector.broadcast %cst_21 : f32 to vector<1x1x256xf32>
    %49 = arith.addf %48, %47 : vector<1x1x256xf32>
    %cst_22 = arith.constant 1.000000e+00 : f32
    %50 = vector.broadcast %cst_22 : f32 to vector<1x1x256xf32>
    %51 = arith.divf %50, %49 : vector<1x1x256xf32>
    %cst_23 = arith.constant 0.000000e+00 : f32
    %52 = vector.broadcast %cst_23 : f32 to vector<1x1x256xf32>
    %53 = arith.cmpf oge, %43, %52 : vector<1x1x256xf32>
    %cst_24 = arith.constant 1.000000e+00 : f32
    %54 = vector.broadcast %cst_24 : f32 to vector<1x1x256xf32>
    %55 = arith.subf %54, %51 : vector<1x1x256xf32>
    %56 = arith.select %53, %51, %55 : vector<1x1x256xi1>, vector<1x1x256xf32>
    %57 = vector.broadcast %56 : vector<1x1x256xf32> to vector<1x32x256xf32>
    %58 = arith.mulf %57, %30 : vector<1x32x256xf32>
    %c0_25 = arith.constant 0 : index
    %c0_26 = arith.constant 0 : index
    %c0_27 = arith.constant 0 : index
    %59 = vector.load %arg5[%c0_25, %c0_26, %c0_27] : memref<1x32x256xf32, #tpu.memory_space<vmem>>, vector<1x32x256xf32>
    tpu.vector_store %arg5[%c0_25, %c0_26, %c0_27], %58 {strides = array<i32>} : memref<1x32x256xf32, #tpu.memory_space<vmem>>, vector<1x32x256xf32>,
    return
  }
  func.func @transform_0(%arg0: i32) -> (i32, i32, i32) {
    %c0_i32 = arith.constant 0 : i32
    %c0_i32_0 = arith.constant 0 : i32
    %c0_i32_1 = arith.constant 0 : i32
    return %arg0, %c0_i32, %c0_i32_0 : i32, i32, i32
  }
  func.func @transform_1(%arg0: i32) -> (i32, i32) {
    %c0_i32 = arith.constant 0 : i32
    %c0_i32_0 = arith.constant 0 : i32
    %c0_i32_1 = arith.constant 0 : i32
    return %c0_i32, %c0_i32_0 : i32, i32
  }
  func.func @transform_2(%arg0: i32) -> (i32, i32) {
    %c0_i32 = arith.constant 0 : i32
    %c0_i32_0 = arith.constant 0 : i32
    %c0_i32_1 = arith.constant 0 : i32
    return %c0_i32, %c0_i32_0 : i32, i32
  }
  func.func @transform_3(%arg0: i32) -> i32 {
    %c0_i32 = arith.constant 0 : i32
    %c0_i32_0 = arith.constant 0 : i32
    return %c0_i32 : i32
  }
  func.func @transform_4(%arg0: i32) -> (i32, i32, i32) {
    %c0_i32 = arith.constant 0 : i32
    %c0_i32_0 = arith.constant 0 : i32
    %c0_i32_1 = arith.constant 0 : i32
    return %arg0, %c0_i32, %c0_i32_0 : i32, i32, i32
  }
}

</mosaic_0001>

<bundles_post_ra>
// kernel: tpu_custom_call.1
= control target key start
LH: loop header
LB: loop body
LE: loop exit
PB: predicated region body
PF: predicated region fallthrough
CT: control target
= control target key end

     0   :  { %s1119_s0 = inlined_call_operand.hbm [shape: f32[2,32,256], index: 0, kind: input, shape index: {}]   ;;  %s1120_s1 = inlined_call_operand.vmem [shape: f32[32,2], index: 1, kind: input, shape index: {}]   ;;  %s1121_s2 = inlined_call_operand.vmem [shape: f32[2,32], index: 2, kind: input, shape index: {}]   ;;  %s1122_s3 = inlined_call_operand.vmem [shape: f32[2], index: 3, kind: input, shape index: {}]   ;;  %s1123_s4 = inlined_call_operand.hbm [shape: f32[2,32,256], index: 4, kind: output, shape index: {}]  }
   0x1   :  { %1124 = sst [smem:[#allocation11_spill]] %s1122_s3 }
   0x2   :  { %9 = vsyncpa [#allocation3], 0 }
   0x3   :  { %11 = vsyncpa [#allocation3 + $0x1], 0 }
   0x4   :  { %12 = vsyncpa [#allocation5], 0 }
   0x5   :  { %13 = vsyncpa [#allocation4], 0 }
   0x6   :  { %15 = vsyncpa [#allocation4 + $0x1], 0  ;;  %s878_s15 = smov 0   ;;  %s880_s16 = smov 0  }
   0x7   :  { %s882_s17 = smov 0   ;;  %s884_s18 = smov 0  }
   0x8 LB: > { %s899_s19 = sadd.s32 4294967295, %s846_s18   ;;  %s631_s20 = sadd.s32 4294967294, %s846_s18   ;;  %s846_s18 = sphi %s884_s18, %s1136_s18   ;;  %s842_s17 = sphi %s882_s17, %s1135_s17   ;;  %s838_s16 = sphi %s880_s16, %s1134_s16   ;;  %s834_s15 = sphi %s878_s15, %s1133_s15  }
   0x9   : > { %s903_s21 = sadd.s32 1, %s846_s18   ;;  %s28_s22 = sadd.s32 1, %s842_s17 }
   0xa   : > { %s25_s23 = ssub.s32 %s846_s18, %s903_s21  ;;  %p35_p0 = scmp.ne.s32.totalorder %s842_s17, %s838_s16 }
   0xb   : > { %p26_p1 = scmp.eq.s32.totalorder %s25_s23, 0  ;;  %p36_p2 = scmp.eq.s32.totalorder %s846_s18, 0 }
   0xc   : > { %p41_p3 = scmp.ne.s32.totalorder %s838_s16, %s834_s15  ;;  %p42_p4 = scmp.eq.s32.totalorder %s899_s19, 0 }
   0xd   : > { %s915_s24 = scalar_select %p26_p1, %s842_s17, %s28_s22  }
   0xe   : > { %p917_p5 = por %p36_p2, %p35_p0  ;;  %p923_p6 = por %p42_p4, %p41_p3 }
   0xf   : > { %p128_p7 = scmp.eq.s32.totalorder %s899_s19, 1  ;;  %p134_p8 = scmp.eq.s32.totalorder %s631_s20, 1 }
  0x10   : > { %p632_p9 = scmp.ge.s32.totalorder %s846_s18, 1  ;;  %p141_p10 = scmp.lt.s32.totalorder %s846_s18, 3 }
  0x11   : > { %p930_p11 = por %p128_p7, %p35_p0  ;;  %p934_p12 = por %p134_p8, %p41_p3 }
  0x12   : > { %p938_p13 = pnand %p632_p9, %p141_p10  ;;  %s1130_s3 = sld [smem:[#allocation11_spill]] }
  0x13   : > { %p674_p2 = scmp.lt.s32.totalorder %s846_s18, 2  ;;  %s170_s7 = sand.u32 1, %s842_s17  }
  0x14   : > { %p661_p1 = pneg %p938_p13  ;;  %s635_s9 = sshll.u32 %s170_s7, 6 }
  0x15   : > { %p954_p3 = pnand %p674_p2, %p917_p5  ;;  %s848_s10 = smov [#allocation6]  }
  0x16   : > { %p662_p7 = pnand %p661_p1, %p42_p4  ;;  %s651_s11 = sshll.u32 %s846_s18, 6 }
  0x17   : > { %s174_s12 = scalar_lea.vmem [#allocation2], %s635_s9  ;;  %s179_s22 = scalar_lea.hbm %s1119_s0, %s651_s11 }
  0x18   : > { %s159_s6 = sshll.u32 %s1130_s3, 4  ;;  %s182_s13 = sshll.u32 %s174_s12, 4  ;;  %s160_s6 = int_to_ptr.vmem [resolvable:$true] %s159_s6  ;;  %s183_s13 = int_to_ptr.vmem [resolvable:$true] %s182_s13 }
  0x19   : > { %664 = dma.vmem_to_smem (!%p662_p7), %s160_s6, 16, %s848_s10, [#allocation5]  }
  0x1a   : > { %s180_s23 = sshll.u32 %s179_s22, 4  ;;  %s171_s30 = scalar_lea.sflag [#allocation3], %s170_s7  ;;  %s181_s23 = int_to_ptr.hbm [resolvable:$true] %s180_s23 }
  0x1b   : > { %s746_s25 = sshra.s32 %s181_s23, 4  ;;  %p750_p8 = pneg %p954_p3  ;;  %s747_s25 = int_to_ptr.hbm [resolvable:$true] %s746_s25 }
  0x1c   : > { %s748_s5 = scalar_lea.hbm %s747_s25, 64  ;;  %s753_s9 = scalar_lea.hbm %s1119_s0, 128 }
  0x1d   : > { %p749_p5 = scmp.ne.s32.totalorder %s747_s25, %s748_s5  ;;  %p754_p1 = scmp.lt.s32.totalorder %s747_s25, %s1119_s0 }
  0x1e   : > { %p755_p2 = scmp.lt.s32.totalorder %s753_s9, %s748_s5 }
  0x1f   : > { %p751_p9 = pnand %p750_p8, %p749_p5 }
  0x20   : > { %p756_p7 = por %p755_p2, %p754_p1 }
  0x21   : > { %p752_p10 = pneg %p751_p9 }
  0x23   : > { %p757_p0 = pnand %p756_p7, %p752_p10 }
  0x25   : > { %760 = shalt.err (!%p757_p0)
}
  0x26   : > { %s849_s7 = smov 256   ;;  %s850_s11 = smov 16  }
  0x27   : > { %668 = dma.hbm_to_vmem [thread:$0]  (!%p954_p3), %s181_s23, 1024, %s183_s13, %s171_s30, %s849_s7, %s849_s7, %s850_s11  }
  0x28   : > { %194 = sbr.rel (%p938_p13) target bundleno = 674 (0x2a2), region = 36  ;;  %s975_s14 = sand.u32 (!%p938_p13), 1, %s838_s16  }
  0x29   : > { %s639_s3 = sshll.u32 (!%p938_p13), %s975_s14, 6  ;;  %s197_s20 = scalar_lea.sflag (!%p938_p13), [#allocation3], %s975_s14 }
  0x2a   : > { %s200_s22 = scalar_lea.vmem (!%p938_p13), [#allocation2], %s639_s3 }
  0x2d   : > { %821 = dma.done.wait (%p923_p6), %s197_s20, 1024  }
  0x2e   : > { %823 = vsyncadd (%p923_p6), %s197_s20, 4294966272 }
  0x2f   : > { %825 = dma.done.wait (%p42_p4), [#allocation5], 16  }
  0x30   : > { %827 = vsyncadd (%p42_p4), [#allocation5], 4294967280 }
  0x31   : > { %211 = sfence }
  0x32   : > { %v989_v0 = vld [vmem:[%s200_s22] sm:$0xff]  ;;  %v991_v1 = vld [vmem:[%s200_s22 + $0x8] sm:$0xff]  ;;  %v1003_v7 = vld [vmem:[%s200_s22 + $0x10] sm:$0xff]  ;;  %v272_v23 = vlaneseq  ;;  %vm277_vm0 = vcmask 130112   ;;  %vm281_vm1 = vcmask 195712   ;;  %vm285_vm2 = vcmask 261312  }
  0x33   : > { %v993_v2 = vld [vmem:[%s200_s22 + $0x20] sm:$0xff]  ;;  %v256_v3 = vmax.f32 %v989_v0, %v991_v1  ;;  %v240_v4 = vadd.f32 %v991_v1, %v989_v0  ;;  %v999_v5 = vld [vmem:[%s200_s22 + $0x28] sm:$0xff]  ;;  %v1005_v8 = vld [vmem:[%s200_s22 + $0x18] sm:$0xff]  ;;  %vm300_vm3 = vcmask 1040384   ;;  %vm306_vm4 = vcmask 261120   ;;  %s458_s9 = sld [smem:[#allocation6]] }
  0x34   : > { %v246_v6 = vadd.f32 %v999_v5, %v993_v2  ;;  %v1007_v9 = vld [vmem:[%s200_s22 + $0x30] sm:$0xff]  ;;  %v1009_v10 = vld [vmem:[%s200_s22 + $0x38] sm:$0xff]  ;;  %v259_v11 = vmax.f32 %v1003_v7, %v1005_v8  ;;  %v243_v12 = vadd.f32 %v1005_v8, %v1003_v7  ;;  %v262_v14 = vmax.f32 %v993_v2, %v999_v5  ;;  %v303_v18 = vld [vmem:[%s1120_s1 + $0x8] sm:$0xff]  ;;  %s645_s12 = sld [smem:[#allocation6 + $0x1]]  ;;  %s652_s7 = sshll.u32 %s899_s19, 6 }
  0x35   : > { %257 = vmax.xlane.f32.xlu2 %v256_v3  ;;  %241 = vadd.xlane.f32.xlu0 %v240_v4  ;;  %v249_v13 = vadd.f32 %v1009_v10, %v1007_v9  ;;  %v265_v15 = vmax.f32 %v1007_v9, %v1009_v10  ;;  %v305_v16 = vld [vmem:[%s1120_s1 + $0x18] sm:$0xff]  ;;  %v304_v17 = vld [vmem:[%s1120_s1 + $0x10] sm:$0xff]  ;;  %v302_v19 = vld [vmem:[%s1120_s1] sm:$0xff]  ;;  %v273_v24 = vand.u32 127, %v272_v23  ;;  %vm340_vm5 = vcmask 1041408   ;;  %s542_s22 = scalar_lea.hbm %s1123_s4, %s652_s7  ;;  %s231_s19 = scalar_lea.vmem [#allocation7], %s639_s3 }
  0x36   : > { %247 = vadd.xlane.f32.xlu1 %v246_v6  ;;  %322 = vmatpush.msra.mxu0 %v305_v16  ;;  %v335_v52 = vld [vmem:[%s1121_s2] sm:$0x3]  ;;  %vm336_vm6 = vcmask 15360   ;;  %v389_v57 = vshrl.u32 %v272_v23, 7  ;;  %s543_s26 = sshll.u32 %s231_s19, 4  ;;  %s545_s29 = sshll.u32 %s542_s22, 4  ;;  %s544_s26 = int_to_ptr.vmem [resolvable:$true] %s543_s26  ;;  %s546_s29 = int_to_ptr.hbm [resolvable:$true] %s545_s29 }
  0x37   : > { %v275_v27 = vadd.s32 4294967288, %v273_v24  ;;  %v279_v30 = vadd.s32 4294967280, %v273_v24  ;;  %v283_v35 = vadd.s32 4294967272, %v273_v24  ;;  %643 = vmatpush.msk.msra.mxu1 %vm340_vm5, %v335_v52  ;;  %s531_s3 = scalar_lea.sflag [#allocation4], %s975_s14  ;;  %s790_s8 = sshra.s32 %s546_s29, 4  ;;  %s791_s8 = int_to_ptr.hbm [resolvable:$true] %s790_s8 }
  0x38   : > { %323 = vmatpush.msra.mxu0 %v304_v17  ;;  %714 = vset.pattern.permute.xlu2 %v389_v57  ;;  %v402_v58 = vadd.s32 16, %v389_v57  ;;  %v396_v59 = vadd.s32 8, %v389_v57  ;;  %v408_v23 = vadd.s32 24, %v389_v57  ;;  %s792_s13 = scalar_lea.hbm %s791_s8, 64  ;;  %s796_s25 = scalar_lea.hbm %s1123_s4, 128 }
  0x39   : > { %p793_p4 = scmp.ne.s32.totalorder %s791_s8, %s792_s13  ;;  %p797_p0 = scmp.lt.s32.totalorder %s791_s8, %s1123_s4 }
  0x3a   : > { %324 = vmatpush.msra.mxu0 %v303_v18  ;;  %716 = vset.pattern.permute.xlu1 %v402_v58  ;;  %p798_p3 = scmp.lt.s32.totalorder %s796_s25, %s792_s13 }
  0x3b   : > { %715 = vset.pattern.permute.xlu0 %v396_v59  ;;  %p794_p6 = pnand %p793_p4, %p930_p11 }
  0x3c   : > { %325 = vmatpush.msra.mxu0 %v302_v19  ;;  %p799_p5 = por %p798_p3, %p797_p0 }
  0x3d   : > { %260 = vmax.xlane.f32.xlu2 %v259_v11  ;;  %244 = vadd.xlane.f32.xlu0 %v243_v12  ;;  %p795_p13 = pneg %p794_p6 }
  0x3e   : > { %250 = vadd.xlane.f32.xlu1 %v249_v13 }
  0x3f   : > { %p800_p8 = pnand %p799_p5, %p795_p13 }
  0x45   : > { %263 = vmax.xlane.f32.xlu0 %v262_v14 }
  0x46   : > { %266 = vmax.xlane.f32.xlu1 %v265_v15 }
  0xa8   : > { %v242_v20 = vpop.xlane.xlu0 %241  ;;  %v258_v21 = vpop.xlane.xlu2 %257 }
  0xa9   : > { %v248_v22 = vpop.xlane.xlu1 %247  ;;  %v252_v25 = vmul.f32 0.00390625, %v242_v20  ;;  %v292_v37 = vperm.slane %v258_v21, %v273_v24 }
  0xaa   : > { %v254_v31 = vmul.f32 0.00390625, %v248_v22 }
  0xab   : > { %v274_v34 = vperm.slane %v252_v25, %v273_v24 }
  0xac   : > { %v280_v40 = vperm.slane %v254_v31, %v279_v30 }
  0xb0   : > { %v245_v26 = vpop.xlane.xlu0 %244  ;;  %v261_v32 = vpop.xlane.xlu2 %260 }
  0xb1   : > { %v253_v28 = vmul.f32 0.00390625, %v245_v26  ;;  %v251_v29 = vpop.xlane.xlu1 %250  ;;  %v293_v38 = vperm.slane %v261_v32, %v275_v27 }
  0xb2   : > { %v255_v36 = vmul.f32 0.00390625, %v251_v29 }
  0xb3   : > { %v276_v33 = vperm.slane %v253_v28, %v275_v27  ;;  %v294_v46 = vsel %vm277_vm0, %v293_v38, %v292_v37 }
  0xb4   : > { %v284_v41 = vperm.slane %v255_v36, %v283_v35 }
  0xb5   : > { %v278_v39 = vsel %vm277_vm0, %v276_v33, %v274_v34 }
  0xb6   : > { %v282_v45 = vsel %vm281_vm1, %v280_v40, %v278_v39 }
  0xb7   : > { %v286_v49 = vsel %vm285_vm2, %v284_v41, %v282_v45 }
  0xb8   : > { %v264_v42 = vpop.xlane.xlu0 %263 }
  0xb9   : > { %v295_v43 = vperm.slane %v264_v42, %v279_v30  ;;  %v267_v44 = vpop.xlane.xlu1 %266 }
  0xba   : > { %v297_v47 = vperm.slane %v267_v44, %v283_v35 }
  0xbb   : > { %v296_v48 = vsel %vm281_vm1, %v295_v43, %v294_v46 }
  0xbc   : > { %v298_v50 = vsel %vm285_vm2, %v297_v47, %v296_v48 }
  0xbd   : > { %v301_v51 = vsel %vm300_vm3, %v286_v49, %v298_v50 }
  0xbe   : > { %642 = vmatmul.msk.f32.vlgmr.msra.gmra.mxu0 %vm306_vm4, %v301_v51 }
 0x13b   : > { %v327_v53 = vpop.f32.mrf.mxu0 }
 0x13c   : > { %v330_v54 = vmax.f32 %v327_v53, 0.0 }
 0x13e   : > { %v332_v55 = vrot.slane %v330_v54, 1 }
 0x140   : > { %v334_v56 = vadd.f32 %v332_v55, %v330_v54 }
 0x142   : > { %644 = vmatmul.msk.f32.vlgmr.msra.gmra.mxu1 %vm336_vm6, %v334_v56 }
 0x1bf   : > { %v361_v60 = vpop.f32.mrf.mxu1 }
 0x1c0   : > { %v364_v61 = vand.u32 2147483647, %v361_v60  ;;  %vm384_vm11 = vcmp.ge.f32.partialorder %v361_v60, 0.0 }
 0x1c2   : > { %v365_v62 = vsub.f32 0.0, %v364_v61 }
 0x1c4   : > { %v366_v63 = vmul.f32 1.442695, %v365_v62 }
 0x1c6   : > { %719 = vpow2.f32 %v366_v63 }
 0x1cc   : > { %v720_v3 = vpop.eup %719 }
 0x1cd   : > { %v368_v4 = vadd.f32 1.0, %v720_v3  ;;  %v460_v3 = vstv %s458_s9 }
 0x1cf   : > { %721 = vrcp.f32 %v368_v4  ;;  %v380_v13 = vand.u32 2147483648, %v368_v4  ;;  %v378_v15 = vand.u32 2147483647, %v368_v4  ;;  %vm374_vm8 = vweird.f32 %v368_v4 }
 0x1d1   : > { %v381_v17 = vor.u32 1.1754944e-38, %v380_v13  ;;  %vm379_vm10 = vcmp.eq.f32.partialorder %v378_v15, 8.507059e+37 }
 0x1d5   : > { %v722_v6 = vpop.eup %721 }
 0x1d6   : > { %v370_v11 = vmul.f32 %v722_v6, %v368_v4  ;;  %vm375_vm7 = vweird.f32 %v722_v6  ;;  %v463_v4 = vstv %s645_s12 }
 0x1d7   : > { %vm376_vm9 = vmor %vm374_vm8, %vm375_vm7 }
 0x1d8   : > { %v371_v12 = vsub.f32 1.0, %v370_v11 }
 0x1da   : > { %v372_v14 = vmul.f32 %v722_v6, %v371_v12 }
 0x1dc   : > { %v373_v16 = vadd.f32 %v722_v6, %v372_v14 }
 0x1de   : > { %v377_v18 = vsel %vm376_vm9, %v722_v6, %v373_v16 }
 0x1df   : > { %v382_v19 = vsel %vm379_vm10, %v381_v17, %v377_v18 }
 0x1e0   : > { %v385_v20 = vsub.f32 1.0, %v382_v19 }
 0x1e2   : > { %v386_v21 = vsel %vm384_vm11, %v382_v19, %v385_v20 }
 0x1e3   : > { %v387_v22 = vperm.slane %v386_v21, 0 }
 0x1e5   : > { %404 = vperm.xlu1 %716, %v387_v22   ;;  %398 = vperm.xlu0 %715, %v387_v22  }
 0x1e6   : > { %392 = vperm.xlu2 %714, %v387_v22  }
 0x1ed   : > { %718 = vset.pattern.permute.xlu0 %v408_v23 }
 0x1ee   : > { %717 = vset.pattern.permute.xlu2 %v408_v23 }
 0x1f6   : > { %410 = vperm.xlu2 %717, %v387_v22  }
 0x240   : > { %v393_v24 = vpop.permute.xlu2 %392 }
 0x241   : > { %v1037_v26 = vmul.f32 %v393_v24, %v989_v0  ;;  %v1040_v27 = vmul.f32 %v393_v24, %v991_v1 }
 0x250   : > { %v411_v25 = vpop.permute.xlu2 %410 }
 0x251   : > { %v1055_v0 = vmul.f32 %v411_v25, %v1007_v9  ;;  %v1058_v1 = vmul.f32 %v411_v25, %v1009_v10 }
 0x257   : > { %v405_v28 = vpop.permute.xlu1 %404  ;;  %v399_v29 = vpop.permute.xlu0 %398 }
 0x258   : > { %v1043_v30 = vmul.f32 %v405_v28, %v993_v2  ;;  %v1046_v31 = vmul.f32 %v405_v28, %v999_v5  ;;  %v1049_v32 = vmul.f32 %v399_v29, %v1003_v7  ;;  %v1052_v33 = vmul.f32 %v399_v29, %v1005_v8 }
 0x25a   : > { %v440_v34 = vmax.f32 %v1037_v26, %v1043_v30  ;;  %v449_v2 = vmax.f32 %v1040_v27, %v1046_v31  ;;  %v420_v5 = vadd.f32 %v1049_v32, %v1037_v26  ;;  %v429_v7 = vadd.f32 %v1052_v33, %v1040_v27 }
 0x25b   : > { %v441_v8 = vmax.f32 %v1049_v32, %v1055_v0  ;;  %v450_v9 = vmax.f32 %v1052_v33, %v1058_v1 }
 0x25c   : > { %v421_v10 = vadd.f32 %v420_v5, %v1043_v30  ;;  %v430_v35 = vadd.f32 %v429_v7, %v1046_v31 }
 0x25d   : > { %v442_v36 = vmax.f32 %v440_v34, %v441_v8  ;;  %v451_v37 = vmax.f32 %v449_v2, %v450_v9 }
 0x25e   : > { %v422_v38 = vadd.f32 %v421_v10, %v1055_v0  ;;  %v431_v39 = vadd.f32 %v430_v35, %v1058_v1 }
 0x25f   : > { %v443_v40 = vrot.slane %v442_v36, 4  ;;  %v452_v41 = vrot.slane %v451_v37, 4 }
 0x260   : > { %v423_v42 = vrot.slane %v422_v38, 4  ;;  %v432_v43 = vrot.slane %v431_v39, 4 }
 0x261   : > { %v444_v44 = vmax.f32 %v442_v36, %v443_v40  ;;  %v453_v45 = vmax.f32 %v451_v37, %v452_v41 }
 0x262   : > { %v424_v46 = vadd.f32 %v423_v42, %v422_v38  ;;  %v433_v47 = vadd.f32 %v432_v43, %v431_v39 }
 0x263   : > { %v445_v48 = vrot.slane %v444_v44, 2  ;;  %v454_v49 = vrot.slane %v453_v45, 2 }
 0x264   : > { %v425_v50 = vrot.slane %v424_v46, 2  ;;  %v434_v51 = vrot.slane %v433_v47, 2 }
 0x265   : > { %v446_v52 = vmax.f32 %v444_v44, %v445_v48  ;;  %v455_v53 = vmax.f32 %v453_v45, %v454_v49 }
 0x266   : > { %v426_v54 = vadd.f32 %v425_v50, %v424_v46  ;;  %v435_v55 = vadd.f32 %v434_v51, %v433_v47 }
 0x267   : > { %v447_v56 = vrot.slane %v446_v52, 1  ;;  %v456_v57 = vrot.slane %v455_v53, 1 }
 0x268   : > { %v427_v58 = vrot.slane %v426_v54, 1  ;;  %v436_v59 = vrot.slane %v435_v55, 1 }
 0x269   : > { %v448_v62 = vmax.f32 %v446_v52, %v447_v56  ;;  %v457_v63 = vmax.f32 %v455_v53, %v456_v57 }
 0x26a   : > { %v428_v60 = vadd.f32 %v427_v58, %v426_v54  ;;  %v437_v61 = vadd.f32 %v436_v59, %v435_v55 }
 0x26b   : > { %v464_v14 = vmul.f32 %v463_v4, %v448_v62  ;;  %v465_v15 = vmul.f32 %v463_v4, %v457_v63 }
 0x26c   : > { %v438_v6 = vmul.f32 0.03125, %v428_v60  ;;  %v439_v11 = vmul.f32 0.03125, %v437_v61 }
 0x26e   : > { %v461_v12 = vmul.f32 %v460_v3, %v438_v6  ;;  %v462_v13 = vmul.f32 %v460_v3, %v439_v11 }
 0x270   : > { %v466_v16 = vadd.f32 %v464_v14, %v461_v12  ;;  %v467_v17 = vadd.f32 %v465_v15, %v462_v13 }
 0x272   : > { %v468_v18 = vand.u32 2147483647, %v466_v16  ;;  %v469_v19 = vand.u32 2147483647, %v467_v17  ;;  %vm508_vm4 = vcmp.ge.f32.partialorder %v466_v16, 0.0  ;;  %vm509_vm5 = vcmp.ge.f32.partialorder %v467_v17, 0.0 }
 0x274   : > { %v470_v20 = vsub.f32 0.0, %v468_v18  ;;  %v471_v21 = vsub.f32 0.0, %v469_v19 }
 0x276   : > { %v472_v22 = vmul.f32 1.442695, %v470_v20  ;;  %v474_v23 = vmul.f32 1.442695, %v471_v21 }
 0x278   : > { %723 = vpow2.f32 %v472_v22 }
 0x279   : > { %725 = vpow2.f32 %v474_v23 }
 0x27e   : > { %v724_v24 = vpop.eup %723 }
 0x27f   : > { %v726_v25 = vpop.eup %725  ;;  %v476_v28 = vadd.f32 1.0, %v724_v24 }
 0x280   : > { %v477_v29 = vadd.f32 1.0, %v726_v25 }
 0x281   : > { %727 = vrcp.f32 %v476_v28  ;;  %v489_v9 = vand.u32 2147483648, %v476_v28  ;;  %v487_v36 = vand.u32 2147483647, %v476_v28  ;;  %vm483_vm14 = vweird.f32 %v476_v28 }
 0x282   : > { %729 = vrcp.f32 %v477_v29  ;;  %v504_v37 = vand.u32 2147483648, %v477_v29  ;;  %v502_v39 = vand.u32 2147483647, %v477_v29  ;;  %vm498_vm0 = vweird.f32 %v477_v29 }
 0x283   : > { %v490_v41 = vor.u32 1.1754944e-38, %v489_v9  ;;  %vm488_vm1 = vcmp.eq.f32.partialorder %v487_v36, 8.507059e+37 }
 0x284   : > { %v505_v44 = vor.u32 1.1754944e-38, %v504_v37  ;;  %vm503_vm3 = vcmp.eq.f32.partialorder %v502_v39, 8.507059e+37 }
 0x287   : > { %v728_v34 = vpop.eup %727 }
 0x288   : > { %v730_v2 = vpop.eup %729  ;;  %v479_v5 = vmul.f32 %v728_v34, %v476_v28  ;;  %vm484_vm12 = vweird.f32 %v728_v34 }
 0x289   : > { %v494_v7 = vmul.f32 %v730_v2, %v477_v29  ;;  %vm499_vm13 = vweird.f32 %v730_v2  ;;  %vm485_vm15 = vmor %vm483_vm14, %vm484_vm12 }
 0x28a   : > { %v480_v8 = vsub.f32 1.0, %v479_v5  ;;  %vm500_vm2 = vmor %vm498_vm0, %vm499_vm13 }
 0x28b   : > { %v495_v10 = vsub.f32 1.0, %v494_v7 }
 0x28c   : > { %v481_v35 = vmul.f32 %v728_v34, %v480_v8 }
 0x28d   : > { %v496_v38 = vmul.f32 %v730_v2, %v495_v10 }
 0x28e   : > { %v482_v40 = vadd.f32 %v728_v34, %v481_v35 }
 0x28f   : > { %v497_v42 = vadd.f32 %v730_v2, %v496_v38 }
 0x290   : > { %v486_v43 = vsel %vm485_vm15, %v728_v34, %v482_v40 }
 0x291   : > { %v491_v45 = vsel %vm488_vm1, %v490_v41, %v486_v43  ;;  %v501_v46 = vsel %vm500_vm2, %v730_v2, %v497_v42 }
 0x292   : > { %v506_v47 = vsel %vm503_vm3, %v505_v44, %v501_v46  ;;  %v510_v48 = vsub.f32 1.0, %v491_v45 }
 0x293   : > { %v511_v49 = vsub.f32 1.0, %v506_v47 }
 0x294   : > { %v512_v50 = vsel %vm508_vm4, %v491_v45, %v510_v48 }
 0x295   : > { %v513_v51 = vsel %vm509_vm5, %v506_v47, %v511_v49  ;;  %v514_v52 = vmul.f32 %v512_v50, %v1037_v26  ;;  %v516_v53 = vmul.f32 %v512_v50, %v1049_v32  ;;  %v518_v56 = vmul.f32 %v512_v50, %v1043_v30 }
 0x296   : > { %v515_v54 = vmul.f32 %v513_v51, %v1040_v27  ;;  %v517_v55 = vmul.f32 %v513_v51, %v1052_v33  ;;  %v519_v57 = vmul.f32 %v513_v51, %v1046_v31  ;;  %v520_v26 = vmul.f32 %v512_v50, %v1055_v0 }
 0x297   : > { %522 = vst [vmem:[%s231_s19] sm:$0xff] %v514_v52  ;;  %v521_v32 = vmul.f32 %v513_v51, %v1058_v1 }
 0x298   : > { %523 = vst [vmem:[%s231_s19 + $0x8] sm:$0xff] %v515_v54 }
 0x299   : > { %524 = vst [vmem:[%s231_s19 + $0x10] sm:$0xff] %v516_v53 }
 0x29a   : > { %525 = vst [vmem:[%s231_s19 + $0x18] sm:$0xff] %v517_v55 }
 0x29b   : > { %526 = vst [vmem:[%s231_s19 + $0x20] sm:$0xff] %v518_v56 }
 0x29c   : > { %527 = vst [vmem:[%s231_s19 + $0x28] sm:$0xff] %v519_v57 }
 0x29d   : > { %528 = vst [vmem:[%s231_s19 + $0x30] sm:$0xff] %v520_v26 }
 0x29e   : > { %529 = vst [vmem:[%s231_s19 + $0x38] sm:$0xff] %v521_v32 }
 0x29f   : > { %803 = shalt.err (!%p800_p8)
}
 0x2a0   : > { %s851_s14 = smov 256   ;;  %s852_s10 = smov 16  }
 0x2a1   : > { %659 = dma.vmem_to_hbm [thread:$0]  (%p930_p11), %s544_s26, 1024, %s546_s29, %s531_s3, %s851_s14, %s851_s14, %s852_s10  }
 0x2a2 PF: > { %s560_s9 = sand.u32 1, %s834_s15   ;;  %p1132_p9 = scmp.ge.s32.totalorder %s846_s18, 2 }
 0x2a3   : > { %s561_s12 = scalar_lea.sflag [#allocation4], %s560_s9 }
 0x2a4   : > { %p670_p10 = pnand %p1132_p9, %p934_p12 }
 0x2a6   : > { %p671_p1 = pneg %p670_p10 }
 0x2a8   : > { %829 = dma.done.wait (%p671_p1), %s561_s12, 1024  }
 0x2a9   : > { %831 = vsyncadd (%p671_p1), %s561_s12, 4294966272  ;;  %p18_p2 = scmp.ge.s32.totalorder %s903_s21, 4   ;;  %s1133_s15 = smov %s838_s16 }
 0x2aa   : > { %s1134_s16 = smov %s842_s17  ;;  %s1135_s17 = smov %s915_s24 }
 0x2ab   : > { %s1136_s18 = smov %s903_s21  ;;  %20 = sbr.rel (!%p18_p2) target bundleno = 8 (0x8), region = 86 }
 0x2b0   :  { %567 = vsyncpa [#allocation3], 1 }
 0x2b1   :  { %569 = vsyncpa [#allocation3 + $0x1], 1 }
 0x2b2   :  { %570 = vsyncpa [#allocation4], 1 }
 0x2b3   :  { %572 = vsyncpa [#allocation4 + $0x1], 1 }
 0x2b4   :  { %573 = vsyncpa [#allocation5], 1 }
 0x2b5   :  { %575 = vsyncpa [#allocation5 + $0x1], 1 }

</bundles_post_ra>
